<compile_context>
chip_gen: v5e
topology: v5e:2x2
jax: 0.10.0
libtpu: 0.0.40
codegen_flags: <defaults>
</compile_context>

<pallas_src>
import jax
import jax.numpy as jnp
from jax.experimental import pallas as pl
from jax.experimental.pallas import tpu as pltpu


# ---------------------------------------------------------------------------
# Generation-aware VMEM budget and tiling helpers.
# ---------------------------------------------------------------------------
def _vmem_budget_bytes():
    """~75% of physical VMEM: ~96 MiB on v5e/v6e, ~48 MiB on v7x."""
    cap = 64 * 1024 * 1024
    try:
        cap = int(getattr(pltpu.get_tpu_info(), "vmem_capacity_bytes", cap))
    except Exception:
        pass
    return (cap * 3) // 4


def _largest_divisor_within(n, limit):
    limit = max(1, min(int(n), int(limit)))
    best = 1
    for d in range(1, limit + 1):
        if n % d == 0:
            best = d
    return best


def _pick_hw_tile(hw, max_elems):
    """Largest multiple-of-128 divisor of hw that fits, else hw itself."""
    if hw <= max_elems:
        return hw
    best = 0
    d = 128
    while d <= hw:
        if hw % d == 0 and d <= max_elems:
            best = d
        d += 128
    # Fallback: whole rows (may exceed the soft budget; compiler will spill).
    return best if best > 0 else hw


# ---------------------------------------------------------------------------
# Pallas kernel 1: fused channel attention (avg+max pool -> shared MLP ->
# sigmoid -> gate), batch-tiled blocks, plus the pooled mean of the gated
# output as a tiny second output (saves a full HBM re-read downstream).
# ---------------------------------------------------------------------------
def channel_attention_pallas(x_flat, w1, w2):
    """x_flat: (N, C, HW); w1: (mid, C); w2: (C, mid).

    Returns (gated (N, C, HW), mean_HW(gated) (N, C))."""
    N, C, HW = x_flat.shape
    mid = w1.shape[0]
    inv_hw = 1.0 / float(HW)
    budget = _vmem_budget_bytes()

    # Input + output blocks, each double-buffered -> ~4x bytes per image.
    # Cap the batch tile at 8 (per-image MLP below is statically unrolled).
    per_image = 4 * C * HW * 4
    bn = _largest_divisor_within(
        N, min(8, max(1, (budget // 2) // max(per_image, 1))))

    def kernel(x_ref, w1_ref, w2_ref, o_ref, p_ref):
        w1f = w1_ref[...].astype(jnp.float32)                      # (mid, C)
        w2f = w2_ref[...].astype(jnp.float32)                      # (C, mid)
        for b in range(bn):                                        # static unroll
            xb = x_ref[b].astype(jnp.float32)                      # (C, HW)
            avg = jnp.sum(xb, axis=-1, keepdims=True) * inv_hw     # (C, 1)
            mx = jnp.max(xb, axis=-1, keepdims=True)               # (C, 1)
            # Shared bias-free 2-layer MLP; avg and max paths as two (C, 1)
            # dots (no lane-width-2 concatenate).
            h_a = jnp.maximum(
                jnp.dot(w1f, avg, preferred_element_type=jnp.float32), 0.0)
            h_m = jnp.maximum(
                jnp.dot(w1f, mx, preferred_element_type=jnp.float32), 0.0)
            logit = (jnp.dot(w2f, h_a, preferred_element_type=jnp.float32)
                     + jnp.dot(w2f, h_m, preferred_element_type=jnp.float32))
            gate = jax.nn.sigmoid(logit)                           # (C, 1)
            o_ref[b] = (xb * gate).astype(o_ref.dtype)
            # mean_HW(gate * x) == gate * mean_HW(x): emit it so the
            # fusion-weight pooling never re-reads the gated tensor from HBM.
            p_ref[b] = gate * avg

    gated, pooled = pl.pallas_call(
        kernel,
        out_shape=(jax.ShapeDtypeStruct((N, C, HW), x_flat.dtype),
                   jax.ShapeDtypeStruct((N, C, 1), jnp.float32)),
        grid=(N // bn,),
        in_specs=[
            pl.BlockSpec((bn, C, HW), lambda n: (n, 0, 0)),
            pl.BlockSpec((mid, C), lambda n: (0, 0)),   # resident across grid
            pl.BlockSpec((C, mid), lambda n: (0, 0)),   # resident across grid
        ],
        out_specs=(pl.BlockSpec((bn, C, HW), lambda n: (n, 0, 0)),
                   pl.BlockSpec((bn, C, 1), lambda n: (n, 0, 0))),
        compiler_params=pltpu.CompilerParams(
            dimension_semantics=("parallel",),
            vmem_limit_bytes=budget,
        ),
    )(x_flat, w1, w2)
    # TODO(synk): for feature maps where even a single image's (C, HW) slab
    # exceeds the VMEM budget, add an HW grid axis with f32 sum/max scratch
    # accumulators (max initialized to -inf) and a second gating sweep.
    return gated, pooled[:, :, 0]


# ---------------------------------------------------------------------------
# Pallas kernel 2: CBAM branch fusion + both residual adds + final ReLU.
#   out = relu(x_cbam + identity + w_ch*ch + w_sp*sp + w_co*co)
# Batch- and HW-tiled, both grid axes parallel (megacore-friendly on v7x).
# ---------------------------------------------------------------------------
def cbam_fuse_pallas(x_cbam, identity, ch, sp, co, wts_n3c):
    """All image args (N, C, HW); wts_n3c: (N, 3, C) per-branch channel weights."""
    N, C, HW = x_cbam.shape
    budget = _vmem_budget_bytes()

    # Per-(batch, channel) weights as (N, C, 1) so the kernel gets directly
    # broadcastable (bn, C, 1) tiles (no in-kernel slicing / relayout).
    w_ch = wts_n3c[:, 0, :, None].astype(jnp.float32)
    w_sp = wts_n3c[:, 1, :, None].astype(jnp.float32)
    w_co = wts_n3c[:, 2, :, None].astype(jnp.float32)

    # 6 image inputs + 1 output, each double-buffered -> ~14 blocks resident.
    per_col = 14 * C * 4
    thw = _pick_hw_tile(HW, max(128, (budget // 2) // max(per_col, 1)))
    bn = _largest_divisor_within(
        N, max(1, (budget // 2) // max(per_col * thw, 1)))

    def kernel(xc_ref, id_ref, ch_ref, sp_ref, co_ref,
               wch_ref, wsp_ref, wco_ref, o_ref):
        out = (xc_ref[...].astype(jnp.float32)
               + id_ref[...].astype(jnp.float32)
               + wch_ref[...] * ch_ref[...].astype(jnp.float32)
               + wsp_ref[...] * sp_ref[...].astype(jnp.float32)
               + wco_ref[...] * co_ref[...].astype(jnp.float32))
        o_ref[...] = jnp.maximum(out, 0.0).astype(o_ref.dtype)

    img_spec = pl.BlockSpec((bn, C, thw), lambda n, h: (n, 0, h))
    wt_spec = pl.BlockSpec((bn, C, 1), lambda n, h: (n, 0, 0))  # resident over hw
    return pl.pallas_call(
        kernel,
        out_shape=jax.ShapeDtypeStruct((N, C, HW), x_cbam.dtype),
        grid=(N // bn, HW // thw),
        in_specs=[img_spec, img_spec, img_spec, img_spec, img_spec,
                  wt_spec, wt_spec, wt_spec],
        out_specs=img_spec,
        compiler_params=pltpu.CompilerParams(
            dimension_semantics=("parallel", "parallel"),
            vmem_limit_bytes=budget,
        ),
    )(x_cbam, identity, ch, sp, co, w_ch, w_sp, w_co)


# ---------------------------------------------------------------------------
# Plain-JAX helpers for the conv/BN parts (left to XLA's conv path).
# ---------------------------------------------------------------------------
def conv2d(x, w, b=None, stride=1, padding=0, groups=1):
    if isinstance(padding, int):
        padding = (padding, padding)
    out = jax.lax.conv_general_dilated(
        x, w,
        window_strides=(stride, stride),
        padding=((padding[0], padding[0]), (padding[1], padding[1])),
        dimension_numbers=("NCHW", "OIHW", "NCHW"),
        feature_group_count=groups)
    if b is not None:
        out = out + b.reshape(1, -1, 1, 1)
    return out


def batchnorm(x, gamma, beta, mean, var, eps=1e-5):
    inv = gamma / jnp.sqrt(var + eps)
    return x * inv.reshape(1, -1, 1, 1) + (beta - mean * inv).reshape(1, -1, 1, 1)


def spatial_attention(x, p):
    """EnhancedSpatialAttention2 forward."""
    avg_out = jnp.mean(x, axis=1, keepdims=True)
    max_out = jnp.max(x, axis=1, keepdims=True)
    x_compress = jnp.concatenate([avg_out, max_out], axis=1)        # (N,2,H,W)
    feats = []
    for wk, bnp in p["convs"]:
        k = wk.shape[-1]
        feats.append(batchnorm(conv2d(x_compress, wk, padding=k // 2), *bnp))
    h = batchnorm(conv2d(avg_out, p["hconv_w"], padding=(0, 7)), *p["hbn"])
    v = batchnorm(conv2d(avg_out, p["vconv_w"], padding=(7, 0)), *p["vbn"])
    all_features = jnp.concatenate(feats + [h, v], axis=1)          # (N,5,H,W)
    fused = conv2d(all_features, p["fuse_w"])                       # (N,1,H,W)
    return x * jax.nn.sigmoid(fused)


def coord_attention(x, p):
    """CoordAtt forward."""
    n, c, h, w = x.shape
    x_h = jnp.mean(x, axis=3, keepdims=True)                        # (N,C,H,1)
    x_w = jnp.transpose(jnp.mean(x, axis=2, keepdims=True), (0, 1, 3, 2))
    y = jnp.concatenate([x_h, x_w], axis=2)                         # (N,C,H+W,1)
    y = conv2d(y, p["conv1_w"], p["conv1_b"])
    y = jnp.maximum(batchnorm(y, *p["bn1"]), 0.0)
    y_h = y[:, :, :h, :]
    y_w = jnp.transpose(y[:, :, h:, :], (0, 1, 3, 2))
    a_h = jax.nn.sigmoid(conv2d(y_h, p["convh_w"], p["convh_b"]))   # (N,C,H,1)
    a_w = jax.nn.sigmoid(conv2d(y_w, p["convw_w"], p["convw_b"]))   # (N,C,1,W)
    return x * a_h * a_w


def cbam_branch_outputs(x, p):
    """EnhancedCBAM branches + per-(n, branch, channel) softmax fusion weights."""
    N, C, H, W = x.shape
    HW = H * W

    ch_flat, ch_pooled = channel_attention_pallas(
        x.reshape(N, C, HW), p["ca_w1"], p["ca_w2"])
    sp = spatial_attention(x, p["sa"])
    co = coord_attention(x, p["coord"])

    # Fusion weights: global-avg-pool each branch, grouped 1x1 conv +
    # LeakyReLU + 1x1 conv, softmax over the 3 branches (tiny compute, XLA).
    # The channel branch's pooled mean comes straight from kernel 1.
    pooled = jnp.stack([ch_pooled,
                        jnp.mean(sp, axis=(2, 3)),
                        jnp.mean(co, axis=(2, 3))], axis=1)          # (N,3,C)
    wg = p["fuse1_w"].reshape(3, C, C)
    y = jnp.einsum("ngi,goi->ngo", pooled, wg) + p["fuse1_b"].reshape(1, 3, C)
    y = jnp.where(y >= 0, y, 0.01 * y)                               # LeakyReLU
    z = (jnp.einsum("ni,oi->no", y.reshape(N, 3 * C),
                    p["fuse2_w"].reshape(3 * C, 3 * C))
         + p["fuse2_b"]).reshape(N, 3, C)
    wts = jax.nn.softmax(z, axis=1)                                  # (N,3,C)
    return ch_flat, sp.reshape(N, C, HW), co.reshape(N, C, HW), wts


def eca_basic_block_forward(x, params):
    """ECABasicBlock forward (stride=1, downsample=None, use_cbam=True)."""
    identity = x
    out = conv2d(x, params["conv1_w"], stride=1, padding=1)
    out = jnp.maximum(batchnorm(out, *params["bn1"]), 0.0)
    out = conv2d(out, params["conv2_w"], padding=1)
    out = batchnorm(out, *params["bn2"])

    N, C, H, W = out.shape
    HW = H * W
    ch_flat, sp_flat, co_flat, wts = cbam_branch_outputs(out, params["cbam"])
    # TODO(synk): optional further fusion — fold the sp/co sigmoid gates into
    # the fusion kernel (pass the small masks instead of the full tensors) to
    # drop two more full-size HBM round trips.
    fused = cbam_fuse_pallas(out.reshape(N, C, HW), identity.reshape(N, C, HW),
                             ch_flat, sp_flat, co_flat, wts)
    return fused.reshape(N, C, H, W)


# ---------------------------------------------------------------------------
# Parameter initialization (deterministic, PyTorch eval-mode BN semantics).
# ---------------------------------------------------------------------------
def init_params(key, channels, reduction_ratio=16):
    C = channels
    mid_ca = C // reduction_ratio            # as in the reference (needs C>=r)
    mip = max(8, C // reduction_ratio)       # coord-attention hidden dim
    ks = [3, 5, 7]

    keys = iter(jax.random.split(key, 64))

    def nrm(shape, scale=0.1):
        return scale * jax.random.normal(next(keys), shape, dtype=jnp.float32)

    def bn(c):
        return (jnp.ones((c,), jnp.float32) + nrm((c,)),   # gamma
                nrm((c,)),                                  # beta
                jnp.zeros((c,), jnp.float32),               # running mean
                jnp.ones((c,), jnp.float32))                # running var

    return {
        "conv1_w": nrm((C, C, 3, 3)),
        "bn1": bn(C),
        "conv2_w": nrm((C, C, 3, 3)),
        "bn2": bn(C),
        "cbam": {
            "ca_w1": nrm((mid_ca, C)),          # Conv2d(C, C//r, 1, bias=False)
            "ca_w2": nrm((C, mid_ca)),          # Conv2d(C//r, C, 1, bias=False)
            "sa": {
                "convs": [(nrm((1, 2, k, k)), bn(1)) for k in ks],
                "hconv_w": nrm((1, 1, 1, 15)), "hbn": bn(1),
                "vconv_w": nrm((1, 1, 15, 1)), "vbn": bn(1),
                "fuse_w": nrm((1, len(ks) + 2, 1, 1)),
            },
            "coord": {
                "conv1_w": nrm((mip, C, 1, 1)), "conv1_b": nrm((mip,)),
                "bn1": bn(mip),
                "convh_w": nrm((C, mip, 1, 1)), "convh_b": nrm((C,)),
                "convw_w": nrm((C, mip, 1, 1)), "convw_b": nrm((C,)),
            },
            "fuse1_w": nrm((3 * C, C, 1, 1)), "fuse1_b": nrm((3 * C,)),
            "fuse2_w": nrm((3 * C, 3 * C, 1, 1)), "fuse2_b": nrm((3 * C,)),
        },
    }


if __name__ == "__main__":
    key = jax.random.PRNGKey(0)
    k_x, k_p = jax.random.split(key)

    # Small shapes: batch=2, channels=32 (so C // 16 >= 1 as in the reference),
    # 16x16 spatial (H*W = 256 -> lane-dense, multiple of 128).
    N, C, H, W = 2, 32, 16, 16
    x = jax.random.normal(k_x, (N, C, H, W), dtype=jnp.float32)
    params = init_params(k_p, C, reduction_ratio=16)

    fwd = jax.jit(eca_basic_block_forward)
    out = jax.block_until_ready(fwd(x, params))

    assert out.shape == (N, C, H, W)
    assert bool(jnp.all(jnp.isfinite(out)))
    print("KERNEL_OK")
</pallas_src>

<mosaic_0001>
module attributes {stable_mosaic.version = 11 : i64} {
  func.func @kernel(%arg0: i32, %arg1: memref<2x32x256xf32, #tpu.memory_space<vmem>>, %arg2: memref<2x32xf32, #tpu.memory_space<vmem>>, %arg3: memref<32x2xf32, #tpu.memory_space<vmem>>, %arg4: memref<2x32x256xf32, #tpu.memory_space<vmem>>, %arg5: memref<2x32x1xf32, #tpu.memory_space<vmem>>) attributes {dimension_semantics = [#tpu.dimension_semantics<parallel>], iteration_bounds = array<i64: 1>, scalar_prefetch = 0 : i64, scratch_operands = 0 : i64, tpu.core_type = #tpu.core_type<tc>, window_params = [{transform_indices = @transform_0, window_bounds = array<i64: 2, 32, 256>}, {pipeline_mode = #tpu.pipeline_mode<synchronous>, transform_indices = @transform_1, window_bounds = array<i64: 2, 32>}, {pipeline_mode = #tpu.pipeline_mode<synchronous>, transform_indices = @transform_2, window_bounds = array<i64: 32, 2>}, {transform_indices = @transform_3, window_bounds = array<i64: 2, 32, 256>}, {transform_indices = @transform_4, window_bounds = array<i64: 2, 32, 1>}]} {
    %c0 = arith.constant 0 : index
    %c0_0 = arith.constant 0 : index
    %0 = vector.load %arg2[%c0, %c0_0] : memref<2x32xf32, #tpu.memory_space<vmem>>, vector<2x32xf32>
    %c0_1 = arith.constant 0 : index
    %c0_2 = arith.constant 0 : index
    %1 = vector.load %arg3[%c0_1, %c0_2] : memref<32x2xf32, #tpu.memory_space<vmem>>, vector<32x2xf32>
    %c0_3 = arith.constant 0 : index
    %c0_4 = arith.constant 0 : index
    %c0_5 = arith.constant 0 : index
    %2 = vector.load %arg1[%c0_3, %c0_4, %c0_5] : memref<2x32x256xf32, #tpu.memory_space<vmem>>, vector<1x32x256xf32>
    %3 = vector.shape_cast %2 : vector<1x32x256xf32> to vector<32x256xf32>
    %cst = arith.constant dense<0.000000e+00> : vector<32xf32>
    %4 = vector.multi_reduction <add>, %3, %cst [1] : vector<32x256xf32> to vector<32xf32>
    %5 = vector.shape_cast %4 : vector<32xf32> to vector<32x1xf32>
    %cst_6 = arith.constant 3.906250e-03 : f32
    %6 = vector.broadcast %cst_6 : f32 to vector<32x1xf32>
    %7 = arith.mulf %5, %6 : vector<32x1xf32>
    %cst_7 = arith.constant dense<0xFF800000> : vector<32xf32>
    %8 = vector.multi_reduction <maximumf>, %3, %cst_7 [1] : vector<32x256xf32> to vector<32xf32>
    %9 = vector.shape_cast %8 : vector<32xf32> to vector<32x1xf32>
    %cst_8 = arith.constant dense<0.000000e+00> : vector<2x1xf32>
    %10 = tpu.matmul %0, %7, %cst_8 {dimension_numbers = #tpu.dot_dimension_numbers<[1], [0], [0], [1], [0, 0, 1, 1], [], []>} : vector<2x32xf32>, vector<32x1xf32>, vector<2x1xf32> -> vector<2x1xf32>
    %cst_9 = arith.constant 0.000000e+00 : f32
    %11 = vector.broadcast %cst_9 : f32 to vector<2x1xf32>
    %12 = arith.maximumf %10, %11 : vector<2x1xf32>
    %cst_10 = arith.constant dense<0.000000e+00> : vector<2x1xf32>
    %13 = tpu.matmul %0, %9, %cst_10 {dimension_numbers = #tpu.dot_dimension_numbers<[1], [0], [0], [1], [0, 0, 1, 1], [], []>} : vector<2x32xf32>, vector<32x1xf32>, vector<2x1xf32> -> vector<2x1xf32>
    %cst_11 = arith.constant 0.000000e+00 : f32
    %14 = vector.broadcast %cst_11 : f32 to vector<2x1xf32>
    %15 = arith.maximumf %13, %14 : vector<2x1xf32>
    %cst_12 = arith.constant dense<0.000000e+00> : vector<32x1xf32>
    %16 = tpu.matmul %1, %12, %cst_12 {dimension_numbers = #tpu.dot_dimension_numbers<[1], [0], [0], [1], [0, 0, 1, 1], [], []>} : vector<32x2xf32>, vector<2x1xf32>, vector<32x1xf32> -> vector<32x1xf32>
    %cst_13 = arith.constant dense<0.000000e+00> : vector<32x1xf32>
    %17 = tpu.matmul %1, %15, %cst_13 {dimension_numbers = #tpu.dot_dimension_numbers<[1], [0], [0], [1], [0, 0, 1, 1], [], []>} : vector<32x2xf32>, vector<2x1xf32>, vector<32x1xf32> -> vector<32x1xf32>
    %18 = arith.addf %16, %17 : vector<32x1xf32>
    %19 = arith.negf %18 : vector<32x1xf32>
    %20 = math.exp %19 : vector<32x1xf32>
    %cst_14 = arith.constant 1.000000e+00 : f32
    %21 = vector.broadcast %cst_14 : f32 to vector<32x1xf32>
    %22 = arith.addf %21, %20 : vector<32x1xf32>
    %23 = arith.divf %21, %22 : vector<32x1xf32>
    %24 = vector.broadcast %23 : vector<32x1xf32> to vector<32x256xf32>
    %25 = arith.mulf %3, %24 : vector<32x256xf32>
    %c0_15 = arith.constant 0 : index
    %c0_16 = arith.constant 0 : index
    %c0_17 = arith.constant 0 : index
    %26 = vector.load %arg4[%c0_15, %c0_16, %c0_17] : memref<2x32x256xf32, #tpu.memory_space<vmem>>, vector<1x32x256xf32>
    %27 = vector.shape_cast %26 : vector<1x32x256xf32> to vector<32x256xf32>
    %28 = vector.shape_cast %25 : vector<32x256xf32> to vector<1x32x256xf32>
    tpu.vector_store %arg4[%c0_15, %c0_16, %c0_17], %28 {strides = array<i32>} : memref<2x32x256xf32, #tpu.memory_space<vmem>>, vector<1x32x256xf32>,
    %29 = arith.mulf %23, %7 : vector<32x1xf32>
    %c0_18 = arith.constant 0 : index
    %c0_19 = arith.constant 0 : index
    %c0_20 = arith.constant 0 : index
    %30 = vector.load %arg5[%c0_18, %c0_19, %c0_20] : memref<2x32x1xf32, #tpu.memory_space<vmem>>, vector<1x32x1xf32>
    %31 = vector.shape_cast %30 : vector<1x32x1xf32> to vector<32x1xf32>
    %32 = vector.shape_cast %29 : vector<32x1xf32> to vector<1x32x1xf32>
    tpu.vector_store %arg5[%c0_18, %c0_19, %c0_20], %32 {strides = array<i32>} : memref<2x32x1xf32, #tpu.memory_space<vmem>>, vector<1x32x1xf32>,
    %c1 = arith.constant 1 : index
    %c0_21 = arith.constant 0 : index
    %c0_22 = arith.constant 0 : index
    %33 = vector.load %arg1[%c1, %c0_21, %c0_22] : memref<2x32x256xf32, #tpu.memory_space<vmem>>, vector<1x32x256xf32>
    %34 = vector.shape_cast %33 : vector<1x32x256xf32> to vector<32x256xf32>
    %cst_23 = arith.constant dense<0.000000e+00> : vector<32xf32>
    %35 = vector.multi_reduction <add>, %34, %cst_23 [1] : vector<32x256xf32> to vector<32xf32>
    %36 = vector.shape_cast %35 : vector<32xf32> to vector<32x1xf32>
    %cst_24 = arith.constant 3.906250e-03 : f32
    %37 = vector.broadcast %cst_24 : f32 to vector<32x1xf32>
    %38 = arith.mulf %36, %37 : vector<32x1xf32>
    %cst_25 = arith.constant dense<0xFF800000> : vector<32xf32>
    %39 = vector.multi_reduction <maximumf>, %34, %cst_25 [1] : vector<32x256xf32> to vector<32xf32>
    %40 = vector.shape_cast %39 : vector<32xf32> to vector<32x1xf32>
    %cst_26 = arith.constant dense<0.000000e+00> : vector<2x1xf32>
    %41 = tpu.matmul %0, %38, %cst_26 {dimension_numbers = #tpu.dot_dimension_numbers<[1], [0], [0], [1], [0, 0, 1, 1], [], []>} : vector<2x32xf32>, vector<32x1xf32>, vector<2x1xf32> -> vector<2x1xf32>
    %cst_27 = arith.constant 0.000000e+00 : f32
    %42 = vector.broadcast %cst_27 : f32 to vector<2x1xf32>
    %43 = arith.maximumf %41, %42 : vector<2x1xf32>
    %cst_28 = arith.constant dense<0.000000e+00> : vector<2x1xf32>
    %44 = tpu.matmul %0, %40, %cst_28 {dimension_numbers = #tpu.dot_dimension_numbers<[1], [0], [0], [1], [0, 0, 1, 1], [], []>} : vector<2x32xf32>, vector<32x1xf32>, vector<2x1xf32> -> vector<2x1xf32>
    %cst_29 = arith.constant 0.000000e+00 : f32
    %45 = vector.broadcast %cst_29 : f32 to vector<2x1xf32>
    %46 = arith.maximumf %44, %45 : vector<2x1xf32>
    %cst_30 = arith.constant dense<0.000000e+00> : vector<32x1xf32>
    %47 = tpu.matmul %1, %43, %cst_30 {dimension_numbers = #tpu.dot_dimension_numbers<[1], [0], [0], [1], [0, 0, 1, 1], [], []>} : vector<32x2xf32>, vector<2x1xf32>, vector<32x1xf32> -> vector<32x1xf32>
    %cst_31 = arith.constant dense<0.000000e+00> : vector<32x1xf32>
    %48 = tpu.matmul %1, %46, %cst_31 {dimension_numbers = #tpu.dot_dimension_numbers<[1], [0], [0], [1], [0, 0, 1, 1], [], []>} : vector<32x2xf32>, vector<2x1xf32>, vector<32x1xf32> -> vector<32x1xf32>
    %49 = arith.addf %47, %48 : vector<32x1xf32>
    %50 = arith.negf %49 : vector<32x1xf32>
    %51 = math.exp %50 : vector<32x1xf32>
    %cst_32 = arith.constant 1.000000e+00 : f32
    %52 = vector.broadcast %cst_32 : f32 to vector<32x1xf32>
    %53 = arith.addf %52, %51 : vector<32x1xf32>
    %54 = arith.divf %52, %53 : vector<32x1xf32>
    %55 = vector.broadcast %54 : vector<32x1xf32> to vector<32x256xf32>
    %56 = arith.mulf %34, %55 : vector<32x256xf32>
    %c1_33 = arith.constant 1 : index
    %c0_34 = arith.constant 0 : index
    %c0_35 = arith.constant 0 : index
    %57 = vector.load %arg4[%c1_33, %c0_34, %c0_35] : memref<2x32x256xf32, #tpu.memory_space<vmem>>, vector<1x32x256xf32>
    %58 = vector.shape_cast %57 : vector<1x32x256xf32> to vector<32x256xf32>
    %59 = vector.shape_cast %56 : vector<32x256xf32> to vector<1x32x256xf32>
    tpu.vector_store %arg4[%c1_33, %c0_34, %c0_35], %59 {strides = array<i32>} : memref<2x32x256xf32, #tpu.memory_space<vmem>>, vector<1x32x256xf32>,
    %60 = arith.mulf %54, %38 : vector<32x1xf32>
    %c1_36 = arith.constant 1 : index
    %c0_37 = arith.constant 0 : index
    %c0_38 = arith.constant 0 : index
    %61 = vector.load %arg5[%c1_36, %c0_37, %c0_38] : memref<2x32x1xf32, #tpu.memory_space<vmem>>, vector<1x32x1xf32>
    %62 = vector.shape_cast %61 : vector<1x32x1xf32> to vector<32x1xf32>
    %63 = vector.shape_cast %60 : vector<32x1xf32> to vector<1x32x1xf32>
    tpu.vector_store %arg5[%c1_36, %c0_37, %c0_38], %63 {strides = array<i32>} : memref<2x32x1xf32, #tpu.memory_space<vmem>>, vector<1x32x1xf32>,
    return
  }
  func.func @transform_0(%arg0: i32) -> (i32, i32, i32) {
    %c0_i32 = arith.constant 0 : i32
    %c0_i32_0 = arith.constant 0 : i32
    %c0_i32_1 = arith.constant 0 : i32
    return %arg0, %c0_i32, %c0_i32_0 : i32, i32, i32
  }
  func.func @transform_1(%arg0: i32) -> (i32, i32) {
    %c0_i32 = arith.constant 0 : i32
    %c0_i32_0 = arith.constant 0 : i32
    %c0_i32_1 = arith.constant 0 : i32
    return %c0_i32, %c0_i32_0 : i32, i32
  }
  func.func @transform_2(%arg0: i32) -> (i32, i32) {
    %c0_i32 = arith.constant 0 : i32
    %c0_i32_0 = arith.constant 0 : i32
    %c0_i32_1 = arith.constant 0 : i32
    return %c0_i32, %c0_i32_0 : i32, i32
  }
  func.func @transform_3(%arg0: i32) -> (i32, i32, i32) {
    %c0_i32 = arith.constant 0 : i32
    %c0_i32_0 = arith.constant 0 : i32
    %c0_i32_1 = arith.constant 0 : i32
    return %arg0, %c0_i32, %c0_i32_0 : i32, i32, i32
  }
  func.func @transform_4(%arg0: i32) -> (i32, i32, i32) {
    %c0_i32 = arith.constant 0 : i32
    %c0_i32_0 = arith.constant 0 : i32
    %c0_i32_1 = arith.constant 0 : i32
    return %arg0, %c0_i32, %c0_i32_0 : i32, i32, i32
  }
}

module attributes {stable_mosaic.version = 11 : i64} {
  func.func @kernel(%arg0: i32, %arg1: i32, %arg2: memref<2x32x256xf32, #tpu.memory_space<vmem>>, %arg3: memref<2x32x256xf32, #tpu.memory_space<vmem>>, %arg4: memref<2x32x256xf32, #tpu.memory_space<vmem>>, %arg5: memref<2x32x256xf32, #tpu.memory_space<vmem>>, %arg6: memref<2x32x256xf32, #tpu.memory_space<vmem>>, %arg7: memref<2x32x1xf32, #tpu.memory_space<vmem>>, %arg8: memref<2x32x1xf32, #tpu.memory_space<vmem>>, %arg9: memref<2x32x1xf32, #tpu.memory_space<vmem>>, %arg10: memref<2x32x256xf32, #tpu.memory_space<vmem>>) attributes {dimension_semantics = [#tpu.dimension_semantics<parallel>, #tpu.dimension_semantics<parallel>], iteration_bounds = array<i64: 1, 1>, scalar_prefetch = 0 : i64, scratch_operands = 0 : i64, tpu.core_type = #tpu.core_type<tc>, window_params = [{transform_indices = @transform_0, window_bounds = array<i64: 2, 32, 256>}, {transform_indices = @transform_1, window_bounds = array<i64: 2, 32, 256>}, {transform_indices = @transform_2, window_bounds = array<i64: 2, 32, 256>}, {transform_indices = @transform_3, window_bounds = array<i64: 2, 32, 256>}, {transform_indices = @transform_4, window_bounds = array<i64: 2, 32, 256>}, {transform_indices = @transform_5, window_bounds = array<i64: 2, 32, 1>}, {transform_indices = @transform_6, window_bounds = array<i64: 2, 32, 1>}, {transform_indices = @transform_7, window_bounds = array<i64: 2, 32, 1>}, {transform_indices = @transform_8, window_bounds = array<i64: 2, 32, 256>}]} {
    %c0 = arith.constant 0 : index
    %c0_0 = arith.constant 0 : index
    %c0_1 = arith.constant 0 : index
    %0 = vector.load %arg2[%c0, %c0_0, %c0_1] : memref<2x32x256xf32, #tpu.memory_space<vmem>>, vector<2x32x256xf32>
    %c0_2 = arith.constant 0 : index
    %c0_3 = arith.constant 0 : index
    %c0_4 = arith.constant 0 : index
    %1 = vector.load %arg3[%c0_2, %c0_3, %c0_4] : memref<2x32x256xf32, #tpu.memory_space<vmem>>, vector<2x32x256xf32>
    %2 = arith.addf %0, %1 : vector<2x32x256xf32>
    %c0_5 = arith.constant 0 : index
    %c0_6 = arith.constant 0 : index
    %c0_7 = arith.constant 0 : index
    %3 = vector.load %arg7[%c0_5, %c0_6, %c0_7] : memref<2x32x1xf32, #tpu.memory_space<vmem>>, vector<2x32x1xf32>
    %c0_8 = arith.constant 0 : index
    %c0_9 = arith.constant 0 : index
    %c0_10 = arith.constant 0 : index
    %4 = vector.load %arg4[%c0_8, %c0_9, %c0_10] : memref<2x32x256xf32, #tpu.memory_space<vmem>>, vector<2x32x256xf32>
    %5 = vector.broadcast %3 : vector<2x32x1xf32> to vector<2x32x256xf32>
    %6 = arith.mulf %5, %4 : vector<2x32x256xf32>
    %7 = arith.addf %2, %6 : vector<2x32x256xf32>
    %c0_11 = arith.constant 0 : index
    %c0_12 = arith.constant 0 : index
    %c0_13 = arith.constant 0 : index
    %8 = vector.load %arg8[%c0_11, %c0_12, %c0_13] : memref<2x32x1xf32, #tpu.memory_space<vmem>>, vector<2x32x1xf32>
    %c0_14 = arith.constant 0 : index
    %c0_15 = arith.constant 0 : index
    %c0_16 = arith.constant 0 : index
    %9 = vector.load %arg5[%c0_14, %c0_15, %c0_16] : memref<2x32x256xf32, #tpu.memory_space<vmem>>, vector<2x32x256xf32>
    %10 = vector.broadcast %8 : vector<2x32x1xf32> to vector<2x32x256xf32>
    %11 = arith.mulf %10, %9 : vector<2x32x256xf32>
    %12 = arith.addf %7, %11 : vector<2x32x256xf32>
    %c0_17 = arith.constant 0 : index
    %c0_18 = arith.constant 0 : index
    %c0_19 = arith.constant 0 : index
    %13 = vector.load %arg9[%c0_17, %c0_18, %c0_19] : memref<2x32x1xf32, #tpu.memory_space<vmem>>, vector<2x32x1xf32>
    %c0_20 = arith.constant 0 : index
    %c0_21 = arith.constant 0 : index
    %c0_22 = arith.constant 0 : index
    %14 = vector.load %arg6[%c0_20, %c0_21, %c0_22] : memref<2x32x256xf32, #tpu.memory_space<vmem>>, vector<2x32x256xf32>
    %15 = vector.broadcast %13 : vector<2x32x1xf32> to vector<2x32x256xf32>
    %16 = arith.mulf %15, %14 : vector<2x32x256xf32>
    %17 = arith.addf %12, %16 : vector<2x32x256xf32>
    %cst = arith.constant 0.000000e+00 : f32
    %18 = vector.broadcast %cst : f32 to vector<2x32x256xf32>
    %19 = arith.maximumf %17, %18 : vector<2x32x256xf32>
    %c0_23 = arith.constant 0 : index
    %c0_24 = arith.constant 0 : index
    %c0_25 = arith.constant 0 : index
    %20 = vector.load %arg10[%c0_23, %c0_24, %c0_25] : memref<2x32x256xf32, #tpu.memory_space<vmem>>, vector<2x32x256xf32>
    tpu.vector_store %arg10[%c0_23, %c0_24, %c0_25], %19 {strides = array<i32>} : memref<2x32x256xf32, #tpu.memory_space<vmem>>, vector<2x32x256xf32>,
    return
  }
  func.func @transform_0(%arg0: i32, %arg1: i32) -> (i32, i32, i32) {
    %c0_i32 = arith.constant 0 : i32
    %c0_i32_0 = arith.constant 0 : i32
    return %arg0, %c0_i32, %arg1 : i32, i32, i32
  }
  func.func @transform_1(%arg0: i32, %arg1: i32) -> (i32, i32, i32) {
    %c0_i32 = arith.constant 0 : i32
    %c0_i32_0 = arith.constant 0 : i32
    return %arg0, %c0_i32, %arg1 : i32, i32, i32
  }
  func.func @transform_2(%arg0: i32, %arg1: i32) -> (i32, i32, i32) {
    %c0_i32 = arith.constant 0 : i32
    %c0_i32_0 = arith.constant 0 : i32
    return %arg0, %c0_i32, %arg1 : i32, i32, i32
  }
  func.func @transform_3(%arg0: i32, %arg1: i32) -> (i32, i32, i32) {
    %c0_i32 = arith.constant 0 : i32
    %c0_i32_0 = arith.constant 0 : i32
    return %arg0, %c0_i32, %arg1 : i32, i32, i32
  }
  func.func @transform_4(%arg0: i32, %arg1: i32) -> (i32, i32, i32) {
    %c0_i32 = arith.constant 0 : i32
    %c0_i32_0 = arith.constant 0 : i32
    return %arg0, %c0_i32, %arg1 : i32, i32, i32
  }
  func.func @transform_5(%arg0: i32, %arg1: i32) -> (i32, i32, i32) {
    %c0_i32 = arith.constant 0 : i32
    %c0_i32_0 = arith.constant 0 : i32
    %c0_i32_1 = arith.constant 0 : i32
    return %arg0, %c0_i32, %c0_i32_0 : i32, i32, i32
  }
  func.func @transform_6(%arg0: i32, %arg1: i32) -> (i32, i32, i32) {
    %c0_i32 = arith.constant 0 : i32
    %c0_i32_0 = arith.constant 0 : i32
    %c0_i32_1 = arith.constant 0 : i32
    return %arg0, %c0_i32, %c0_i32_0 : i32, i32, i32
  }
  func.func @transform_7(%arg0: i32, %arg1: i32) -> (i32, i32, i32) {
    %c0_i32 = arith.constant 0 : i32
    %c0_i32_0 = arith.constant 0 : i32
    %c0_i32_1 = arith.constant 0 : i32
    return %arg0, %c0_i32, %c0_i32_0 : i32, i32, i32
  }
  func.func @transform_8(%arg0: i32, %arg1: i32) -> (i32, i32, i32) {
    %c0_i32 = arith.constant 0 : i32
    %c0_i32_0 = arith.constant 0 : i32
    return %arg0, %c0_i32, %arg1 : i32, i32, i32
  }
}

</mosaic_0001>

<bundles_post_ra>
// kernel: eca_basic_block_forward.2
= control target key start
LH: loop header
LB: loop body
LE: loop exit
PB: predicated region body
PF: predicated region fallthrough
CT: control target
= control target key end

     0   :  { %vm57_vm0 = vcmask 261120   ;;  %vm116_vm1 = vcmask 1041408   ;;  %vm103_vm2 = vcmask 15360   ;;  %vm297_vm5 = vcmask 7168   ;;  %s1045_s0 = inlined_call_operand.vmem [shape: f32[2,32,256], index: 0, kind: input, shape index: {}]   ;;  %s1046_s1 = inlined_call_operand.vmem [shape: f32[2,32], index: 1, kind: input, shape index: {}]   ;;  %s1047_s2 = inlined_call_operand.vmem [shape: f32[32,2], index: 2, kind: input, shape index: {}]   ;;  %s1048_s4 = inlined_call_operand.vmem [shape: f32[2,32,1], index: 4, kind: output, shape index: {1}]   ;;  %s1049_s3 = inlined_call_operand.vmem [shape: f32[2,32,256], index: 3, kind: output, shape index: {0}]  }
   0x1   :  { %v692_v0 = vld [vmem:[%s1045_s0 + $0x30] sm:$0xff]  ;;  %v697_v1 = vld [vmem:[%s1045_s0 + $0x38] sm:$0xff]  ;;  %v702_v2 = vld [vmem:[%s1045_s0 + $0x20] sm:$0xff] }
   0x2   :  { %v38_v3 = vadd.f32 %v697_v1, %v692_v0  ;;  %v54_v4 = vmax.f32 %v692_v0, %v697_v1  ;;  %v711_v5 = vld [vmem:[%s1045_s0 + $0x28] sm:$0xff]  ;;  %v718_v7 = vld [vmem:[%s1045_s0 + $0x10] sm:$0xff]  ;;  %v723_v8 = vld [vmem:[%s1045_s0 + $0x18] sm:$0xff] }
   0x3   :  { %v51_v6 = vmax.f32 %v702_v2, %v711_v5  ;;  %v728_v9 = vld [vmem:[%s1045_s0] sm:$0xff]  ;;  %v733_v10 = vld [vmem:[%s1045_s0 + $0x8] sm:$0xff]  ;;  %v35_v11 = vadd.f32 %v711_v5, %v702_v2  ;;  %v32_v12 = vadd.f32 %v723_v8, %v718_v7  ;;  %v744_v14 = vld [vmem:[%s1045_s0 + $0x70] sm:$0xff]  ;;  %v48_v16 = vmax.f32 %v718_v7, %v723_v8 }
   0x4   :  { %39 = vadd.xlane.f32.xlu0 %v38_v3  ;;  %55 = vmax.xlane.f32.xlu1 %v54_v4  ;;  %v29_v13 = vadd.f32 %v733_v10, %v728_v9  ;;  %v749_v15 = vld [vmem:[%s1045_s0 + $0x78] sm:$0xff]  ;;  %v45_v17 = vmax.f32 %v728_v9, %v733_v10  ;;  %v760_v19 = vld [vmem:[%s1045_s0 + $0x60] sm:$0xff]  ;;  %v765_v20 = vld [vmem:[%s1045_s0 + $0x68] sm:$0xff] }
   0x5   :  { %52 = vmax.xlane.f32.xlu2 %v51_v6  ;;  %v320_v18 = vadd.f32 %v749_v15, %v744_v14  ;;  %v770_v21 = vld [vmem:[%s1045_s0 + $0x50] sm:$0xff]  ;;  %v775_v22 = vld [vmem:[%s1045_s0 + $0x58] sm:$0xff]  ;;  %v317_v23 = vadd.f32 %v765_v20, %v760_v19  ;;  %v336_v24 = vmax.f32 %v744_v14, %v749_v15  ;;  %v786_v26 = vld [vmem:[%s1045_s0 + $0x40] sm:$0xff]  ;;  %v333_v28 = vmax.f32 %v760_v19, %v765_v20 }
   0x6   :  { %v314_v25 = vadd.f32 %v775_v22, %v770_v21  ;;  %v791_v27 = vld [vmem:[%s1045_s0 + $0x48] sm:$0xff]  ;;  %v330_v30 = vmax.f32 %v770_v21, %v775_v22  ;;  %v16_v42 = vld [vmem:[%s1046_s1] sm:$0x3]  ;;  %v19_v4 = vld [vmem:[%s1047_s2 + $0x10] sm:$0xff] }
   0x7   :  { %v311_v29 = vadd.f32 %v791_v27, %v786_v26  ;;  %v327_v31 = vmax.f32 %v786_v26, %v791_v27  ;;  %v17_v59 = vld [vmem:[%s1047_s2] sm:$0xff]  ;;  %v18_v62 = vld [vmem:[%s1047_s2 + $0x8] sm:$0xff] }
   0xc   :  { %36 = vadd.xlane.f32.xlu0 %v35_v11  ;;  %33 = vadd.xlane.f32.xlu1 %v32_v12  ;;  %v20_v12 = vld [vmem:[%s1047_s2 + $0x18] sm:$0xff] }
   0xd   :  { %30 = vadd.xlane.f32.xlu2 %v29_v13 }
  0x14   :  { %49 = vmax.xlane.f32.xlu0 %v48_v16  ;;  %46 = vmax.xlane.f32.xlu1 %v45_v17  ;;  %v663_v16 = vmov 0  }
  0x15   :  { %321 = vadd.xlane.f32.xlu2 %v320_v18  ;;  %628 = vset.pattern.permute.xlu1 %v663_v16 }
  0x16   :  { %629 = vset.pattern.permute.xlu2 %v663_v16  ;;  %630 = vset.pattern.permute.xlu0 %v663_v16 }
  0x1c   :  { %318 = vadd.xlane.f32.xlu0 %v317_v23  ;;  %337 = vmax.xlane.f32.xlu1 %v336_v24 }
  0x1d   :  { %315 = vadd.xlane.f32.xlu2 %v314_v25 }
  0x24   :  { %334 = vmax.xlane.f32.xlu0 %v333_v28  ;;  %312 = vadd.xlane.f32.xlu1 %v311_v29 }
  0x25   :  { %331 = vmax.xlane.f32.xlu2 %v330_v30 }
  0x2c   :  { %328 = vmax.xlane.f32.xlu0 %v327_v31 }
  0x77   :  { %v40_v32 = vpop.xlane.xlu0 %39  ;;  %v56_v33 = vpop.xlane.xlu1 %55 }
  0x78   :  { %v801_v34 = vmul.f32 0.00390625, %v40_v32  ;;  %94 = vmatpush.msra.mxu3 %v56_v33  ;;  %v53_v35 = vpop.xlane.xlu2 %52 }
  0x7a   :  { %73 = vmatpush.msra.mxu2 %v801_v34  ;;  %95 = vmatpush.msra.mxu3 %v53_v35 }
  0x7f   :  { %v37_v36 = vpop.xlane.xlu0 %36  ;;  %v34_v37 = vpop.xlane.xlu1 %33 }
  0x80   :  { %v804_v38 = vmul.f32 0.00390625, %v37_v36  ;;  %v806_v39 = vmul.f32 0.00390625, %v34_v37  ;;  %v31_v40 = vpop.xlane.xlu2 %30 }
  0x81   :  { %v809_v41 = vmul.f32 0.00390625, %v31_v40 }
  0x82   :  { %74 = vmatpush.msra.mxu2 %v804_v38 }
  0x84   :  { %75 = vmatpush.msra.mxu2 %v806_v39 }
  0x86   :  { %76 = vmatpush.msra.mxu2 %v809_v41 }
  0x87   :  { %v50_v43 = vpop.xlane.xlu0 %49  ;;  %v47_v44 = vpop.xlane.xlu1 %46  ;;  %575 = vmatmul.msk.f32.vlgmr.msra.gmra.mxu2 %vm57_vm0, %v16_v42 }
  0x88   :  { %96 = vmatpush.msra.mxu3 %v50_v43  ;;  %v322_v45 = vpop.xlane.xlu2 %321 }
  0x89   :  { %v817_v46 = vmul.f32 0.00390625, %v322_v45 }
  0x8a   :  { %97 = vmatpush.msra.mxu3 %v47_v44 }
  0x8b   :  { %576 = vmatmul.msk.f32.vlgmr.msra.gmra.mxu3 %vm57_vm0, %v16_v42  ;;  %351 = vmatpush.msra.mxu0 %v817_v46 }
  0x8f   :  { %v319_v47 = vpop.xlane.xlu0 %318  ;;  %v338_v48 = vpop.xlane.xlu1 %337 }
  0x90   :  { %v821_v49 = vmul.f32 0.00390625, %v319_v47  ;;  %v316_v50 = vpop.xlane.xlu2 %315  ;;  %372 = vmatpush.msra.mxu1 %v338_v48 }
  0x91   :  { %v823_v51 = vmul.f32 0.00390625, %v316_v50 }
  0x92   :  { %352 = vmatpush.msra.mxu0 %v821_v49 }
  0x94   :  { %353 = vmatpush.msra.mxu0 %v823_v51 }
  0x97   :  { %v335_v52 = vpop.xlane.xlu0 %334  ;;  %v313_v53 = vpop.xlane.xlu1 %312 }
  0x98   :  { %373 = vmatpush.msra.mxu1 %v335_v52  ;;  %v827_v54 = vmul.f32 0.00390625, %v313_v53  ;;  %v332_v55 = vpop.xlane.xlu2 %331 }
  0x9a   :  { %374 = vmatpush.msra.mxu1 %v332_v55  ;;  %354 = vmatpush.msra.mxu0 %v827_v54 }
  0x9b   :  { %599 = vmatmul.msk.f32.vlgmr.msra.gmra.mxu0 %vm57_vm0, %v16_v42 }
  0x9f   :  { %v329_v56 = vpop.xlane.xlu0 %328 }
  0xa0   :  { %375 = vmatpush.msra.mxu1 %v329_v56 }
  0xa1   :  { %600 = vmatmul.msk.f32.vlgmr.msra.gmra.mxu1 %vm57_vm0, %v16_v42 }
 0x10a   :  { %v78_v57 = vpop.f32.mrf.mxu2 }
 0x10b   :  { %v81_v58 = vmax.f32 %v78_v57, 0.0 }
 0x10d   :  { %582 = vmatpush.msk.msrb.mxu3 %vm116_vm1, %v81_v58 }
 0x10e   :  { %v99_v60 = vpop.f32.mrf.mxu3  ;;  %583 = vmatmul.msk.f32.vlgmr.msrb.gmra.mxu3 %vm103_vm2, %v17_v59 }
 0x10f   :  { %v102_v61 = vmax.f32 %v99_v60, 0.0 }
 0x111   :  { %577 = vmatpush.msk.msrb.mxu2 %vm116_vm1, %v102_v61 }
 0x112   :  { %578 = vmatmul.msk.f32.vlgmr.msrb.gmra.mxu2 %vm103_vm2, %v17_v59 }
 0x116   :  { %584 = vmatmul.msk.f32.gmra.mxu3 %vm103_vm2, %v18_v62 }
 0x118   :  { %v356_v63 = vpop.f32.mrf.mxu0 }
 0x119   :  { %v359_v3 = vmax.f32 %v356_v63, 0.0 }
 0x11a   :  { %579 = vmatmul.msk.f32.gmra.mxu2 %vm103_vm2, %v18_v62 }
 0x11b   :  { %606 = vmatpush.msk.msrb.mxu1 %vm116_vm1, %v359_v3 }
 0x11c   :  { %607 = vmatmul.msk.f32.vlgmr.msrb.gmra.mxu1 %vm103_vm2, %v17_v59 }
 0x11e   :  { %v377_v6 = vpop.f32.mrf.mxu1  ;;  %585 = vmatmul.msk.f32.gmra.mxu3 %vm103_vm2, %v19_v4 }
 0x11f   :  { %v380_v11 = vmax.f32 %v377_v6, 0.0 }
 0x121   :  { %601 = vmatpush.msk.msrb.mxu0 %vm116_vm1, %v380_v11 }
 0x122   :  { %580 = vmatmul.msk.f32.gmra.mxu2 %vm103_vm2, %v19_v4  ;;  %602 = vmatmul.msk.f32.vlgmr.msrb.gmra.mxu0 %vm103_vm2, %v17_v59 }
 0x124   :  { %608 = vmatmul.msk.f32.gmra.mxu1 %vm103_vm2, %v18_v62 }
 0x126   :  { %586 = vmatmul.msk.f32.gmra.mxu3 %vm103_vm2, %v20_v12 }
 0x12a   :  { %581 = vmatmul.msk.f32.gmra.mxu2 %vm103_vm2, %v20_v12  ;;  %603 = vmatmul.msk.f32.gmra.mxu0 %vm103_vm2, %v18_v62 }
 0x12c   :  { %609 = vmatmul.msk.f32.gmra.mxu1 %vm103_vm2, %v19_v4 }
 0x132   :  { %604 = vmatmul.msk.f32.gmra.mxu0 %vm103_vm2, %v19_v4 }
 0x134   :  { %610 = vmatmul.msk.f32.gmra.mxu1 %vm103_vm2, %v20_v12 }
 0x13a   :  { %605 = vmatmul.msk.f32.gmra.mxu0 %vm103_vm2, %v20_v12 }
 0x191   :  { %v169_v13 = vpop.f32.mrf.mxu3 }
 0x195   :  { %v137_v17 = vpop.f32.mrf.mxu2 }
 0x196   :  { %v170_v18 = vadd.f32 %v169_v13, %v137_v17 }
 0x198   :  { %v587_v23 = vmul.f32 -1.442695, %v170_v18 }
 0x199   :  { %v172_v24 = vpop.f32.mrf.mxu3  ;;  %v433_v25 = vpop.f32.mrf.mxu1 }
 0x19a   :  { %631 = vpow2.f32 %v587_v23 }
 0x19d   :  { %v140_v28 = vpop.f32.mrf.mxu2 }
 0x19e   :  { %v173_v29 = vadd.f32 %v172_v24, %v140_v28 }
 0x19f   :  { %v401_v30 = vpop.f32.mrf.mxu0 }
 0x1a0   :  { %v632_v31 = vpop.eup %631  ;;  %v588_v32 = vmul.f32 -1.442695, %v173_v29  ;;  %v434_v33 = vadd.f32 %v433_v25, %v401_v30 }
 0x1a1   :  { %v193_v35 = vadd.f32 1.0, %v632_v31  ;;  %v175_v36 = vpop.f32.mrf.mxu3  ;;  %v436_v37 = vpop.f32.mrf.mxu1 }
 0x1a2   :  { %633 = vpow2.f32 %v588_v32  ;;  %v611_v40 = vmul.f32 -1.442695, %v434_v33 }
 0x1a3   :  { %635 = vrcp.f32 %v193_v35  ;;  %v206_v61 = vand.u32 2147483647, %v193_v35  ;;  %v208_v63 = vand.u32 2147483648, %v193_v35  ;;  %vm202_vm3 = vweird.f32 %v193_v35 }
 0x1a4   :  { %637 = vpow2.f32 %v611_v40 }
 0x1a5   :  { %v143_v42 = vpop.f32.mrf.mxu2  ;;  %vm870_vm6 = vcmp.eq.f32.partialorder %v206_v61, 8.507059e+37  ;;  %v209_v24 = vor.u32 1.1754944e-38, %v208_v63 }
 0x1a6   :  { %v176_v43 = vadd.f32 %v175_v36, %v143_v42 }
 0x1a7   :  { %v404_v44 = vpop.f32.mrf.mxu0 }
 0x1a8   :  { %v634_v45 = vpop.eup %633  ;;  %v589_v47 = vmul.f32 -1.442695, %v176_v43  ;;  %v437_v48 = vadd.f32 %v436_v37, %v404_v44 }
 0x1a9   :  { %v636_v50 = vpop.eup %635  ;;  %v864_v52 = vadd.f32 1.0, %v634_v45  ;;  %v178_v58 = vpop.f32.mrf.mxu3 }
 0x1aa   :  { %v638_v53 = vpop.eup %637  ;;  %639 = vpow2.f32 %v589_v47  ;;  %v612_v55 = vmul.f32 -1.442695, %v437_v48  ;;  %v198_v56 = vmul.f32 %v636_v50, %v193_v35  ;;  %v439_v59 = vpop.f32.mrf.mxu1  ;;  %vm203_vm4 = vweird.f32 %v636_v50 }
 0x1ab   :  { %641 = vrcp.f32 %v864_v52  ;;  %v867_v57 = vadd.f32 1.0, %v638_v53  ;;  %vm204_vm7 = vmor %vm202_vm3, %vm203_vm4  ;;  %v221_v25 = vand.u32 2147483647, %v864_v52  ;;  %v223_v28 = vand.u32 2147483648, %v864_v52 }
 0x1ac   :  { %643 = vpow2.f32 %v612_v55  ;;  %v199_v60 = vsub.f32 1.0, %v198_v56  ;;  %vm217_vm8 = vweird.f32 %v864_v52 }
 0x1ad   :  { %645 = vrcp.f32 %v867_v57  ;;  %v146_v62 = vpop.f32.mrf.mxu2  ;;  %v470_v37 = vand.u32 2147483647, %v867_v57  ;;  %v472_v45 = vand.u32 2147483648, %v867_v57  ;;  %vm894_vm10 = vcmp.eq.f32.partialorder %v221_v25, 8.507059e+37 }
 0x1ae   :  { %v179_v3 = vadd.f32 %v178_v58, %v146_v62  ;;  %v200_v4 = vmul.f32 %v636_v50, %v199_v60  ;;  %v224_v53 = vor.u32 1.1754944e-38, %v223_v28  ;;  %vm466_vm11 = vweird.f32 %v867_v57 }
 0x1af   :  { %v407_v6 = vpop.f32.mrf.mxu0  ;;  %vm899_vm12 = vcmp.eq.f32.partialorder %v470_v37, 8.507059e+37  ;;  %v473_v63 = vor.u32 1.1754944e-38, %v472_v45 }
 0x1b0   :  { %v640_v11 = vpop.eup %639  ;;  %v590_v12 = vmul.f32 -1.442695, %v179_v3  ;;  %v440_v13 = vadd.f32 %v439_v59, %v407_v6  ;;  %v201_v16 = vadd.f32 %v636_v50, %v200_v4 }
 0x1b1   :  { %v642_v18 = vpop.eup %641  ;;  %v874_v23 = vadd.f32 1.0, %v640_v11 }
 0x1b2   :  { %v644_v29 = vpop.eup %643  ;;  %647 = vpow2.f32 %v590_v12  ;;  %v613_v30 = vmul.f32 -1.442695, %v440_v13  ;;  %v205_v31 = vsel %vm204_vm7, %v636_v50, %v201_v16  ;;  %v213_v32 = vmul.f32 %v642_v18, %v864_v52  ;;  %v442_v44 = vpop.f32.mrf.mxu1 }
 0x1b3   :  { %v646_v33 = vpop.eup %645  ;;  %649 = vrcp.f32 %v874_v23  ;;  %v880_v35 = vadd.f32 1.0, %v644_v29  ;;  %v210_v36 = vsel %vm870_vm6, %v209_v24, %v205_v31  ;;  %vm218_vm9 = vweird.f32 %v642_v18 }
 0x1b4   :  { %651 = vpow2.f32 %v613_v30  ;;  %259 = vperm.xlu1 %628, %v210_v36   ;;  %v293_v40 = vmul.f32 %v210_v36, %v809_v41  ;;  %v214_v42 = vsub.f32 1.0, %v213_v32  ;;  %v462_v43 = vmul.f32 %v646_v33, %v867_v57  ;;  %vm219_vm14 = vmor %vm217_vm8, %vm218_vm9 }
 0x1b5   :  { %653 = vrcp.f32 %v880_v35  ;;  %vm467_vm13 = vweird.f32 %v646_v33  ;;  %v485_v3 = vand.u32 2147483647, %v880_v35  ;;  %v487_v4 = vand.u32 2147483648, %v880_v35 }
 0x1b6   :  { %298 = vst.msk [vmem:[%s1048_s4] sm:$0xff] %vm297_vm5, %v293_v40  ;;  %v215_v47 = vmul.f32 %v642_v18, %v214_v42  ;;  %v463_v48 = vsub.f32 1.0, %v462_v43  ;;  %vm468_vm15 = vmor %vm466_vm11, %vm467_vm13  ;;  %v236_v25 = vand.u32 2147483647, %v874_v23  ;;  %v238_v32 = vand.u32 2147483648, %v874_v23 }
 0x1b7   :  { %v410_v50 = vpop.f32.mrf.mxu0  ;;  %vm232_vm0 = vweird.f32 %v874_v23  ;;  %vm481_vm2 = vweird.f32 %v880_v35  ;;  %vm936_vm4 = vcmp.eq.f32.partialorder %v485_v3, 8.507059e+37 }
 0x1b8   :  { %v648_v56 = vpop.eup %647  ;;  %v443_v58 = vadd.f32 %v442_v44, %v410_v50  ;;  %v216_v59 = vadd.f32 %v642_v18, %v215_v47  ;;  %v464_v60 = vmul.f32 %v646_v33, %v463_v48  ;;  %vm237_vm6 = vcmp.eq.f32.partialorder %v236_v25, 8.507059e+37 }
 0x1b9   :  { %v650_v61 = vpop.eup %649  ;;  %v903_v62 = vadd.f32 1.0, %v648_v56  ;;  %v239_v43 = vor.u32 1.1754944e-38, %v238_v32 }
 0x1ba   :  { %v652_v6 = vpop.eup %651  ;;  %v614_v11 = vmul.f32 -1.442695, %v443_v58  ;;  %v220_v12 = vsel %vm219_vm14, %v642_v18, %v216_v59  ;;  %v465_v13 = vadd.f32 %v646_v33, %v464_v60  ;;  %v228_v16 = vmul.f32 %v650_v61, %v874_v23 }
 0x1bb   :  { %v654_v17 = vpop.eup %653  ;;  %655 = vrcp.f32 %v903_v62  ;;  %v911_v24 = vadd.f32 1.0, %v652_v6  ;;  %v225_v52 = vsel %vm894_vm10, %v224_v53, %v220_v12  ;;  %vm233_vm1 = vweird.f32 %v650_v61 }
 0x1bc   :  { %657 = vpow2.f32 %v614_v11  ;;  %264 = vperm.xlu2 %629, %v225_v52   ;;  %v294_v18 = vmul.f32 %v225_v52, %v806_v39  ;;  %v469_v28 = vsel %vm468_vm15, %v646_v33, %v465_v13  ;;  %v477_v29 = vmul.f32 %v654_v17, %v880_v35  ;;  %vm234_vm7 = vmor %vm232_vm0, %vm233_vm1 }
 0x1bd   :  { %659 = vrcp.f32 %v911_v24  ;;  %v474_v30 = vsel %vm899_vm12, %v473_v63, %v469_v28  ;;  %v229_v31 = vsub.f32 1.0, %v228_v16  ;;  %vm482_vm3 = vweird.f32 %v654_v17 }
 0x1be   :  { %299 = vst.msk [vmem:[%s1048_s4 + $0x8] sm:$0xff] %vm297_vm5, %v294_v18  ;;  %523 = vperm.xlu1 %628, %v474_v30   ;;  %v558_v57 = vmul.f32 %v474_v30, %v827_v54  ;;  %v478_v39 = vsub.f32 1.0, %v477_v29  ;;  %v488_v54 = vor.u32 1.1754944e-38, %v487_v4  ;;  %vm247_vm8 = vweird.f32 %v903_v62  ;;  %vm483_vm9 = vmor %vm481_vm2, %vm482_vm3 }
 0x1bf   :  { %v230_v33 = vmul.f32 %v650_v61, %v229_v31  ;;  %v251_v47 = vand.u32 2147483647, %v903_v62  ;;  %v253_v53 = vand.u32 2147483648, %v903_v62  ;;  %v500_v6 = vand.u32 2147483647, %v911_v24 }
 0x1c0   :  { %623 = vst.msk [vmem:[%s1048_s4 + $0x20] sm:$0xff] %vm297_vm5, %v558_v57  ;;  %v479_v36 = vmul.f32 %v654_v17, %v478_v39  ;;  %v502_v11 = vand.u32 2147483648, %v911_v24  ;;  %vm496_vm14 = vweird.f32 %v911_v24 }
 0x1c1   :  { %v656_v40 = vpop.eup %655  ;;  %v231_v42 = vadd.f32 %v650_v61, %v230_v33  ;;  %v254_v4 = vor.u32 1.1754944e-38, %v253_v53  ;;  %vm252_vm12 = vcmp.eq.f32.partialorder %v251_v47, 8.507059e+37  ;;  %vm501_vm0 = vcmp.eq.f32.partialorder %v500_v6, 8.507059e+37 }
 0x1c2   :  { %v658_v23 = vpop.eup %657  ;;  %v480_v44 = vadd.f32 %v654_v17, %v479_v36  ;;  %v243_v45 = vmul.f32 %v656_v40, %v903_v62  ;;  %vm248_vm10 = vweird.f32 %v656_v40 }
 0x1c3   :  { %v660_v48 = vpop.eup %659  ;;  %v460_v50 = vadd.f32 1.0, %v658_v23  ;;  %v235_v41 = vsel %vm234_vm7, %v650_v61, %v231_v42  ;;  %vm249_vm11 = vmor %vm247_vm8, %vm248_vm10 }
 0x1c4   :  { %v484_v55 = vsel %vm483_vm9, %v654_v17, %v480_v44  ;;  %v240_v56 = vsel %vm237_vm6, %v239_v43, %v235_v41  ;;  %v244_v58 = vsub.f32 1.0, %v243_v45  ;;  %v492_v59 = vmul.f32 %v660_v48, %v911_v24 }
 0x1c5   :  { %661 = vrcp.f32 %v460_v50  ;;  %v489_v60 = vsel %vm936_vm4, %v488_v54, %v484_v55  ;;  %269 = vperm.xlu0 %630, %v240_v56   ;;  %v295_v63 = vmul.f32 %v240_v56, %v804_v38  ;;  %vm497_vm13 = vweird.f32 %v660_v48 }
 0x1c6   :  { %528 = vperm.xlu2 %629, %v489_v60   ;;  %v559_v35 = vmul.f32 %v489_v60, %v823_v51  ;;  %v245_v3 = vmul.f32 %v656_v40, %v244_v58  ;;  %v493_v61 = vsub.f32 1.0, %v492_v59  ;;  %vm498_vm15 = vmor %vm496_vm14, %vm497_vm13  ;;  %v503_v17 = vor.u32 1.1754944e-38, %v502_v11 }
 0x1c7   :  { %300 = vst.msk [vmem:[%s1048_s4 + $0x10] sm:$0xff] %vm297_vm5, %v295_v63  ;;  %vm511_vm1 = vweird.f32 %v460_v50  ;;  %v517_v29 = vand.u32 2147483648, %v460_v50  ;;  %v515_v31 = vand.u32 2147483647, %v460_v50 }
 0x1c8   :  { %624 = vst.msk [vmem:[%s1048_s4 + $0x28] sm:$0xff] %vm297_vm5, %v559_v35  ;;  %v246_v38 = vadd.f32 %v656_v40, %v245_v3  ;;  %v494_v51 = vmul.f32 %v660_v48, %v493_v61 }
 0x1c9   :  { %v518_v32 = vor.u32 1.1754944e-38, %v517_v29  ;;  %vm516_vm4 = vcmp.eq.f32.partialorder %v515_v31, 8.507059e+37 }
 0x1ca   :  { %v250_v12 = vsel %vm249_vm11, %v656_v40, %v246_v38  ;;  %v495_v13 = vadd.f32 %v660_v48, %v494_v51 }
 0x1cb   :  { %v662_v62 = vpop.eup %661  ;;  %v255_v16 = vsel %vm252_vm12, %v254_v4, %v250_v12 }
 0x1cc   :  { %v296_v52 = vmul.f32 %v255_v16, %v801_v34  ;;  %v499_v25 = vsel %vm498_vm15, %v660_v48, %v495_v13  ;;  %v507_v18 = vmul.f32 %v662_v62, %v460_v50  ;;  %vm512_vm2 = vweird.f32 %v662_v62 }
 0x1cd   :  { %v504_v28 = vsel %vm501_vm0, %v503_v17, %v499_v25  ;;  %vm513_vm3 = vmor %vm511_vm1, %vm512_vm2 }
 0x1ce   :  { %301 = vst.msk [vmem:[%s1048_s4 + $0x18] sm:$0xff] %vm297_vm5, %v296_v52  ;;  %274 = vperm.xlu2 %629, %v255_v16   ;;  %533 = vperm.xlu1 %628, %v504_v28   ;;  %v560_v24 = vmul.f32 %v504_v28, %v821_v49  ;;  %v508_v30 = vsub.f32 1.0, %v507_v18 }
 0x1d0   :  { %625 = vst.msk [vmem:[%s1048_s4 + $0x30] sm:$0xff] %vm297_vm5, %v560_v24  ;;  %v509_v34 = vmul.f32 %v662_v62, %v508_v30 }
 0x1d2   :  { %v510_v57 = vadd.f32 %v662_v62, %v509_v34 }
 0x1d4   :  { %v514_v39 = vsel %vm513_vm3, %v662_v62, %v510_v57 }
 0x1d5   :  { %v519_v33 = vsel %vm516_vm4, %v518_v32, %v514_v39 }
 0x1d6   :  { %538 = vperm.xlu2 %629, %v519_v33   ;;  %v561_v36 = vmul.f32 %v519_v33, %v817_v46 }
 0x1d8   :  { %626 = vst.msk [vmem:[%s1048_s4 + $0x38] sm:$0xff] %vm297_vm5, %v561_v36 }
 0x216   :  { %v265_v49 = vpop.permute.xlu2 %264 }
 0x217   :  { %v279_v37 = vmul.f32 %v265_v49, %v718_v7  ;;  %v280_v40 = vmul.f32 %v265_v49, %v723_v8 }
 0x219   :  { %287 = vst [vmem:[%s1049_s3 + $0x10] sm:$0xff] %v279_v37 }
 0x21a   :  { %288 = vst [vmem:[%s1049_s3 + $0x18] sm:$0xff] %v280_v40 }
 0x220   :  { %v529_v54 = vpop.permute.xlu2 %528 }
 0x221   :  { %v543_v46 = vmul.f32 %v770_v21, %v529_v54  ;;  %v544_v42 = vmul.f32 %v775_v22, %v529_v54 }
 0x223   :  { %617 = vst [vmem:[%s1049_s3 + $0x50] sm:$0xff] %v543_v46 }
 0x224   :  { %618 = vst [vmem:[%s1049_s3 + $0x58] sm:$0xff] %v544_v42 }
 0x226   :  { %v260_v7 = vpop.permute.xlu1 %259 }
 0x227   :  { %v277_v8 = vmul.f32 %v260_v7, %v728_v9  ;;  %v278_v43 = vmul.f32 %v260_v7, %v733_v10 }
 0x228   :  { %v275_v23 = vpop.permute.xlu2 %274 }
 0x229   :  { %285 = vst [vmem:[%s1049_s3] sm:$0xff] %v277_v8  ;;  %v283_v21 = vmul.f32 %v275_v23, %v692_v0  ;;  %v284_v22 = vmul.f32 %v275_v23, %v697_v1 }
 0x22a   :  { %286 = vst [vmem:[%s1049_s3 + $0x8] sm:$0xff] %v278_v43 }
 0x22b   :  { %291 = vst [vmem:[%s1049_s3 + $0x30] sm:$0xff] %v283_v21 }
 0x22c   :  { %292 = vst [vmem:[%s1049_s3 + $0x38] sm:$0xff] %v284_v22 }
 0x230   :  { %v524_v9 = vpop.permute.xlu1 %523  ;;  %v539_v10 = vpop.permute.xlu2 %538 }
 0x231   :  { %v541_v44 = vmul.f32 %v786_v26, %v524_v9  ;;  %v542_v0 = vmul.f32 %v791_v27, %v524_v9  ;;  %v547_v1 = vmul.f32 %v744_v14, %v539_v10  ;;  %v548_v45 = vmul.f32 %v749_v15, %v539_v10 }
 0x233   :  { %615 = vst [vmem:[%s1049_s3 + $0x40] sm:$0xff] %v541_v44 }
 0x234   :  { %616 = vst [vmem:[%s1049_s3 + $0x48] sm:$0xff] %v542_v0 }
 0x235   :  { %621 = vst [vmem:[%s1049_s3 + $0x70] sm:$0xff] %v547_v1 }
 0x236   :  { %622 = vst [vmem:[%s1049_s3 + $0x78] sm:$0xff] %v548_v45 }
 0x237   :  { %v270_v26 = vpop.permute.xlu0 %269 }
 0x238   :  { %v281_v14 = vmul.f32 %v270_v26, %v702_v2  ;;  %v282_v15 = vmul.f32 %v270_v26, %v711_v5 }
 0x23a   :  { %289 = vst [vmem:[%s1049_s3 + $0x20] sm:$0xff] %v281_v14 }
 0x23b   :  { %290 = vst [vmem:[%s1049_s3 + $0x28] sm:$0xff] %v282_v15 }
 0x240   :  { %v534_v27 = vpop.permute.xlu1 %533 }
 0x241   :  { %v545_v47 = vmul.f32 %v760_v19, %v534_v27  ;;  %v546_v48 = vmul.f32 %v765_v20, %v534_v27 }
 0x243   :  { %619 = vst [vmem:[%s1049_s3 + $0x60] sm:$0xff] %v545_v47 }
 0x244   :  { %620 = vst [vmem:[%s1049_s3 + $0x68] sm:$0xff] %v546_v48 }

// kernel: eca_basic_block_forward.3
= control target key start
LH: loop header
LB: loop body
LE: loop exit
PB: predicated region body
PF: predicated region fallthrough
CT: control target
= control target key end

     0   :  { %v405_v0 = vmov 0   ;;  %s867_s5 = inlined_call_operand.vmem [shape: f32[2,32,1], index: 5, kind: input, shape index: {}]   ;;  %s868_s6 = inlined_call_operand.vmem [shape: f32[2,32,1], index: 6, kind: input, shape index: {}]   ;;  %s869_s7 = inlined_call_operand.vmem [shape: f32[2,32,1], index: 7, kind: input, shape index: {}]   ;;  %s870_s0 = inlined_call_operand.vmem [shape: f32[2,32,256], index: 0, kind: input, shape index: {}]   ;;  %s871_s1 = inlined_call_operand.vmem [shape: f32[2,32,256], index: 1, kind: input, shape index: {}]   ;;  %s872_s2 = inlined_call_operand.vmem [shape: f32[2,32,256], index: 2, kind: input, shape index: {}]   ;;  %s873_s3 = inlined_call_operand.vmem [shape: f32[2,32,256], index: 3, kind: input, shape index: {}]   ;;  %s874_s4 = inlined_call_operand.vmem [shape: f32[2,32,256], index: 4, kind: input, shape index: {}]   ;;  %s875_s8 = inlined_call_operand.vmem [shape: f32[2,32,256], index: 8, kind: output, shape index: {}]  }
   0x1   :  { %404 = vset.pattern.permute.xlu2 %v405_v0  ;;  %403 = vset.pattern.permute.xlu1 %v405_v0  ;;  %v81_v1 = vld [vmem:[%s867_s5 + $0x20] sm:$0xff]  ;;  %v79_v2 = vld [vmem:[%s867_s5 + $0x10] sm:$0xff]  ;;  %v82_v4 = vld [vmem:[%s867_s5 + $0x28] sm:$0xff] }
   0x2   :  { %v77_v3 = vld [vmem:[%s867_s5] sm:$0xff]  ;;  %402 = vset.pattern.permute.xlu0 %v405_v0  ;;  %123 = vperm.xlu2 %404, %v81_v1   ;;  %v80_v5 = vld [vmem:[%s867_s5 + $0x18] sm:$0xff]  ;;  %v78_v6 = vld [vmem:[%s867_s5 + $0x8] sm:$0xff] }
   0x3   :  { %113 = vperm.xlu1 %403, %v79_v2   ;;  %103 = vperm.xlu0 %402, %v77_v3   ;;  %v173_v7 = vld [vmem:[%s868_s6] sm:$0xff]  ;;  %v84_v8 = vld [vmem:[%s867_s5 + $0x38] sm:$0xff]  ;;  %v83_v9 = vld [vmem:[%s867_s5 + $0x30] sm:$0xff] }
   0x4   :  { %v176_v10 = vld [vmem:[%s868_s6 + $0x18] sm:$0xff]  ;;  %v175_v11 = vld [vmem:[%s868_s6 + $0x10] sm:$0xff]  ;;  %v174_v12 = vld [vmem:[%s868_s6 + $0x8] sm:$0xff] }
   0x5   :  { %v179_v13 = vld [vmem:[%s868_s6 + $0x30] sm:$0xff]  ;;  %v178_v14 = vld [vmem:[%s868_s6 + $0x28] sm:$0xff]  ;;  %v177_v15 = vld [vmem:[%s868_s6 + $0x20] sm:$0xff] }
   0x6   :  { %v270_v16 = vld [vmem:[%s869_s7 + $0x8] sm:$0xff]  ;;  %v269_v17 = vld [vmem:[%s869_s7] sm:$0xff]  ;;  %v180_v18 = vld [vmem:[%s868_s6 + $0x38] sm:$0xff] }
   0x7   :  { %v273_v19 = vld [vmem:[%s869_s7 + $0x20] sm:$0xff]  ;;  %v272_v20 = vld [vmem:[%s869_s7 + $0x18] sm:$0xff]  ;;  %v271_v21 = vld [vmem:[%s869_s7 + $0x10] sm:$0xff] }
   0x8   :  { %v276_v22 = vld [vmem:[%s869_s7 + $0x38] sm:$0xff]  ;;  %v275_v23 = vld [vmem:[%s869_s7 + $0x30] sm:$0xff]  ;;  %v274_v24 = vld [vmem:[%s869_s7 + $0x28] sm:$0xff] }
   0x9   :  { %v31_v36 = vld [vmem:[%s870_s0 + $0x10] sm:$0xff]  ;;  %v32_v37 = vld [vmem:[%s870_s0 + $0x18] sm:$0xff]  ;;  %v37_v49 = vld [vmem:[%s870_s0 + $0x40] sm:$0xff] }
   0xa   :  { %128 = vperm.xlu2 %404, %v82_v4   ;;  %v47_v38 = vld [vmem:[%s871_s1 + $0x10] sm:$0xff]  ;;  %v48_v39 = vld [vmem:[%s871_s1 + $0x18] sm:$0xff]  ;;  %v38_v50 = vld [vmem:[%s870_s0 + $0x48] sm:$0xff] }
   0xb   :  { %118 = vperm.xlu1 %403, %v80_v5   ;;  %108 = vperm.xlu0 %402, %v78_v6   ;;  %v87_v40 = vld [vmem:[%s872_s2 + $0x10] sm:$0xff]  ;;  %v88_v41 = vld [vmem:[%s872_s2 + $0x18] sm:$0xff]  ;;  %v63_v43 = vadd.f32 %v47_v38, %v31_v36  ;;  %v64_v44 = vadd.f32 %v48_v39, %v32_v37  ;;  %v53_v51 = vld [vmem:[%s871_s1 + $0x40] sm:$0xff] }
   0xc   :  { %v183_v47 = vld [vmem:[%s873_s3 + $0x10] sm:$0xff]  ;;  %v184_v48 = vld [vmem:[%s873_s3 + $0x18] sm:$0xff]  ;;  %v54_v56 = vld [vmem:[%s871_s1 + $0x48] sm:$0xff] }
   0xd   :  { %v279_v52 = vld [vmem:[%s874_s4 + $0x10] sm:$0xff]  ;;  %v280_v53 = vld [vmem:[%s874_s4 + $0x18] sm:$0xff]  ;;  %v93_v57 = vld [vmem:[%s872_s2 + $0x40] sm:$0xff] }
   0xe   :  { %v94_v58 = vld [vmem:[%s872_s2 + $0x48] sm:$0xff]  ;;  %v39_v63 = vld [vmem:[%s870_s0 + $0x50] sm:$0xff]  ;;  %v33_v1 = vld [vmem:[%s870_s0 + $0x20] sm:$0xff] }
   0xf   :  { %v55_v0 = vld [vmem:[%s871_s1 + $0x50] sm:$0xff]  ;;  %v49_v2 = vld [vmem:[%s871_s1 + $0x20] sm:$0xff]  ;;  %v30_v4 = vld [vmem:[%s870_s0 + $0x8] sm:$0xff] }
  0x10   :  { %v29_v3 = vld [vmem:[%s870_s0] sm:$0xff]  ;;  %v642_v36 = vadd.f32 %v55_v0, %v39_v63  ;;  %v644_v37 = vadd.f32 %v49_v2, %v33_v1  ;;  %v44_v38 = vld [vmem:[%s870_s0 + $0x78] sm:$0xff]  ;;  %v59_v39 = vld [vmem:[%s871_s1 + $0x70] sm:$0xff] }
  0x11   :  { %v182_v1 = vld [vmem:[%s873_s3 + $0x8] sm:$0xff]  ;;  %v91_v2 = vld [vmem:[%s872_s2 + $0x30] sm:$0xff] }
  0x12   :  { %199 = vperm.xlu2 %404, %v173_v7  }
  0x13   :  { %138 = vperm.xlu1 %403, %v84_v8   ;;  %133 = vperm.xlu0 %402, %v83_v9   ;;  %v69_v9 = vadd.f32 %v53_v51, %v37_v49 }
  0x1a   :  { %214 = vperm.xlu2 %404, %v176_v10   ;;  %v70_v10 = vadd.f32 %v54_v56, %v38_v50 }
  0x1b   :  { %209 = vperm.xlu1 %403, %v175_v11   ;;  %204 = vperm.xlu0 %402, %v174_v12   ;;  %v45_v11 = vld [vmem:[%s871_s1] sm:$0xff]  ;;  %v46_v12 = vld [vmem:[%s871_s1 + $0x8] sm:$0xff] }
  0x22   :  { %229 = vperm.xlu2 %404, %v179_v13   ;;  %v85_v13 = vld [vmem:[%s872_s2] sm:$0xff] }
  0x23   :  { %224 = vperm.xlu1 %403, %v178_v14   ;;  %219 = vperm.xlu0 %402, %v177_v15  }
  0x2a   :  { %300 = vperm.xlu2 %404, %v270_v16   ;;  %v34_v16 = vld [vmem:[%s870_s0 + $0x28] sm:$0xff] }
  0x2b   :  { %295 = vperm.xlu1 %403, %v269_v17   ;;  %234 = vperm.xlu0 %402, %v180_v18   ;;  %v50_v17 = vld [vmem:[%s871_s1 + $0x28] sm:$0xff] }
  0x2c   :  { %v86_v18 = vld [vmem:[%s872_s2 + $0x8] sm:$0xff] }
  0x32   :  { %315 = vperm.xlu2 %404, %v273_v19   ;;  %v35_v19 = vld [vmem:[%s870_s0 + $0x30] sm:$0xff] }
  0x33   :  { %310 = vperm.xlu1 %403, %v272_v20   ;;  %305 = vperm.xlu0 %402, %v271_v21   ;;  %v51_v20 = vld [vmem:[%s871_s1 + $0x30] sm:$0xff] }
  0x3a   :  { %330 = vperm.xlu2 %404, %v276_v22  }
  0x3b   :  { %325 = vperm.xlu1 %403, %v275_v23   ;;  %320 = vperm.xlu0 %402, %v274_v24   ;;  %v43_v24 = vld [vmem:[%s870_s0 + $0x70] sm:$0xff] }
  0x3c   :  { %v75_v63 = vadd.f32 %v59_v39, %v43_v24  ;;  %v196_v24 = vld [vmem:[%s873_s3 + $0x78] sm:$0xff] }
  0x5c   :  { %v124_v25 = vpop.permute.xlu2 %123 }
  0x5d   :  { %v149_v14 = vmul.f32 %v124_v25, %v93_v57  ;;  %v150_v15 = vmul.f32 %v124_v25, %v94_v58  ;;  %v189_v25 = vld [vmem:[%s873_s3 + $0x40] sm:$0xff] }
  0x5e   :  { %v181_v58 = vld [vmem:[%s873_s3] sm:$0xff] }
  0x5f   :  { %v165_v51 = vadd.f32 %v149_v14, %v69_v9  ;;  %v90_v9 = vld [vmem:[%s872_s2 + $0x28] sm:$0xff] }
  0x64   :  { %v523_v26 = vpop.permute.xlu2 %128 }
  0x6c   :  { %v525_v27 = vpop.permute.xlu2 %199 }
  0x74   :  { %v527_v28 = vpop.permute.xlu2 %214 }
  0x75   :  { %v529_v29 = vpop.permute.xlu1 %113  ;;  %v531_v30 = vpop.permute.xlu0 %103 }
  0x7c   :  { %v535_v33 = vpop.permute.xlu2 %229 }
  0x7d   :  { %v533_v31 = vpop.permute.xlu1 %118  ;;  %v109_v32 = vpop.permute.xlu0 %108 }
  0x7e   :  { %v143_v45 = vmul.f32 %v109_v32, %v87_v40  ;;  %v144_v46 = vmul.f32 %v109_v32, %v88_v41  ;;  %v190_v32 = vld [vmem:[%s873_s3 + $0x48] sm:$0xff]  ;;  %v60_v40 = vld [vmem:[%s871_s1 + $0x78] sm:$0xff] }
  0x7f   :  { %v76_v0 = vadd.f32 %v60_v40, %v44_v38  ;;  %v292_v38 = vld [vmem:[%s874_s4 + $0x78] sm:$0xff] }
  0x80   :  { %v159_v59 = vadd.f32 %v143_v45, %v63_v43  ;;  %v160_v60 = vadd.f32 %v144_v46, %v64_v44  ;;  %v61_v43 = vadd.f32 %v45_v11, %v29_v3  ;;  %v62_v44 = vadd.f32 %v46_v12, %v30_v4  ;;  %v92_v3 = vld [vmem:[%s872_s2 + $0x38] sm:$0xff] }
  0x81   :  { %v141_v45 = vmul.f32 %v531_v30, %v85_v13  ;;  %v142_v46 = vmul.f32 %v531_v30, %v86_v18  ;;  %v99_v30 = vld [vmem:[%s872_s2 + $0x70] sm:$0xff]  ;;  %v277_v18 = vld [vmem:[%s874_s4] sm:$0xff] }
  0x83   :  { %v158_v11 = vadd.f32 %v142_v46, %v62_v44 }
  0x84   :  { %v301_v42 = vpop.permute.xlu2 %300 }
  0x85   :  { %v537_v34 = vpop.permute.xlu1 %138  ;;  %v539_v35 = vpop.permute.xlu0 %133  ;;  %v335_v5 = vmul.f32 %v301_v42, %v279_v52  ;;  %v336_v6 = vmul.f32 %v301_v42, %v280_v53  ;;  %v166_v52 = vadd.f32 %v150_v15, %v70_v10  ;;  %v95_v53 = vld [vmem:[%s872_s2 + $0x50] sm:$0xff]  ;;  %v157_v10 = vadd.f32 %v141_v45, %v61_v43 }
  0x86   :  { %v155_v12 = vmul.f32 %v537_v34, %v99_v30  ;;  %v709_v14 = vmul.f32 %v523_v26, %v95_v53 }
  0x8c   :  { %v316_v21 = vpop.permute.xlu2 %315 }
  0x8d   :  { %v580_v54 = vpop.permute.xlu1 %209  ;;  %v205_v55 = vpop.permute.xlu0 %204 }
  0x8e   :  { %v239_v61 = vmul.f32 %v205_v55, %v183_v47  ;;  %v240_v62 = vmul.f32 %v205_v55, %v184_v48  ;;  %v285_v47 = vld [vmem:[%s874_s4 + $0x40] sm:$0xff]  ;;  %v286_v48 = vld [vmem:[%s874_s4 + $0x48] sm:$0xff]  ;;  %v100_v55 = vld [vmem:[%s872_s2 + $0x78] sm:$0xff] }
  0x8f   :  { %v341_v4 = vmul.f32 %v316_v21, %v285_v47  ;;  %v156_v13 = vmul.f32 %v537_v34, %v100_v55  ;;  %v278_v34 = vld [vmem:[%s874_s4 + $0x8] sm:$0xff]  ;;  %v188_v47 = vld [vmem:[%s873_s3 + $0x38] sm:$0xff] }
  0x90   :  { %v255_v7 = vadd.f32 %v239_v61, %v159_v59  ;;  %v256_v8 = vadd.f32 %v240_v62, %v160_v60  ;;  %v680_v59 = vadd.f32 %v50_v17, %v34_v16  ;;  %v36_v60 = vld [vmem:[%s870_s0 + $0x38] sm:$0xff]  ;;  %v67_v62 = vadd.f32 %v51_v20, %v35_v19 }
  0x91   :  { %v52_v61 = vld [vmem:[%s871_s1 + $0x38] sm:$0xff]  ;;  %v237_v19 = vmul.f32 %v525_v27, %v181_v58  ;;  %v238_v20 = vmul.f32 %v525_v27, %v182_v1  ;;  %v146_v27 = vmul.f32 %v529_v29, %v90_v9  ;;  %v172_v43 = vadd.f32 %v156_v13, %v76_v0  ;;  %v98_v9 = vld [vmem:[%s872_s2 + $0x68] sm:$0xff] }
  0x92   :  { %v351_v22 = vadd.f32 %v335_v5, %v255_v7  ;;  %v352_v23 = vadd.f32 %v336_v6, %v256_v8  ;;  %v342_v5 = vmul.f32 %v316_v21, %v286_v48  ;;  %v89_v8 = vld [vmem:[%s872_s2 + $0x20] sm:$0xff]  ;;  %v68_v15 = vadd.f32 %v52_v61, %v36_v60  ;;  %v42_v61 = vld [vmem:[%s870_s0 + $0x68] sm:$0xff] }
  0x93   :  { %v147_v21 = vmul.f32 %v533_v31, %v91_v2  ;;  %v253_v45 = vadd.f32 %v237_v19, %v157_v10  ;;  %v185_v48 = vld [vmem:[%s873_s3 + $0x20] sm:$0xff] }
  0x94   :  { %v367_v41 = vmax.f32 %v351_v22, 0.0  ;;  %v368_v42 = vmax.f32 %v352_v23, 0.0  ;;  %v148_v22 = vmul.f32 %v533_v31, %v92_v3  ;;  %v195_v23 = vld [vmem:[%s873_s3 + $0x70] sm:$0xff]  ;;  %v281_v19 = vld [vmem:[%s874_s4 + $0x20] sm:$0xff] }
  0x95   :  { %v663_v49 = vpop.permute.xlu1 %224  ;;  %v220_v50 = vpop.permute.xlu0 %219  ;;  %v291_v31 = vld [vmem:[%s874_s4 + $0x70] sm:$0xff]  ;;  %v163_v55 = vadd.f32 %v147_v21, %v67_v62  ;;  %v58_v62 = vld [vmem:[%s871_s1 + $0x68] sm:$0xff]  ;;  %v96_v21 = vld [vmem:[%s872_s2 + $0x58] sm:$0xff] }
  0x96   :  { %383 = vst [vmem:[%s875_s8 + $0x10] sm:$0xff] %v367_v41  ;;  %v245_v56 = vmul.f32 %v220_v50, %v189_v25  ;;  %v246_v57 = vmul.f32 %v220_v50, %v190_v32  ;;  %v145_v25 = vmul.f32 %v529_v29, %v89_v8  ;;  %v331_v32 = vpop.permute.xlu2 %330  ;;  %v187_v41 = vld [vmem:[%s873_s3 + $0x30] sm:$0xff]  ;;  %v254_v29 = vadd.f32 %v238_v20, %v158_v11  ;;  %v186_v50 = vld [vmem:[%s873_s3 + $0x28] sm:$0xff]  ;;  %v97_v8 = vld [vmem:[%s872_s2 + $0x60] sm:$0xff] }
  0x97   :  { %384 = vst [vmem:[%s875_s8 + $0x18] sm:$0xff] %v368_v42  ;;  %v171_v42 = vadd.f32 %v155_v12, %v75_v63  ;;  %v347_v58 = vmul.f32 %v331_v32, %v291_v31  ;;  %v348_v60 = vmul.f32 %v331_v32, %v292_v38  ;;  %v57_v63 = vld [vmem:[%s871_s1 + $0x60] sm:$0xff]  ;;  %v282_v20 = vld [vmem:[%s874_s4 + $0x28] sm:$0xff] }
  0x98   :  { %v261_v6 = vadd.f32 %v245_v56, %v165_v51  ;;  %v262_v7 = vadd.f32 %v246_v57, %v166_v52  ;;  %v164_v56 = vadd.f32 %v148_v22, %v68_v15  ;;  %v41_v57 = vld [vmem:[%s870_s0 + $0x60] sm:$0xff]  ;;  %v161_v15 = vadd.f32 %v145_v25, %v644_v37  ;;  %v40_v37 = vld [vmem:[%s870_s0 + $0x58] sm:$0xff] }
  0x99   :  { %v153_v25 = vmul.f32 %v539_v35, %v97_v8 }
  0x9a   :  { %v357_v16 = vadd.f32 %v341_v4, %v261_v6  ;;  %v358_v17 = vadd.f32 %v342_v5, %v262_v7  ;;  %v243_v4 = vmul.f32 %v527_v28, %v187_v41  ;;  %v244_v5 = vmul.f32 %v527_v28, %v188_v47  ;;  %v283_v28 = vld [vmem:[%s874_s4 + $0x30] sm:$0xff]  ;;  %v192_v41 = vld [vmem:[%s873_s3 + $0x58] sm:$0xff]  ;;  %v194_v47 = vld [vmem:[%s873_s3 + $0x68] sm:$0xff] }
  0x9b   :  { %v241_v6 = vmul.f32 %v580_v54, %v185_v48  ;;  %v242_v7 = vmul.f32 %v580_v54, %v186_v50  ;;  %v162_v54 = vadd.f32 %v146_v27, %v680_v59  ;;  %v56_v59 = vld [vmem:[%s871_s1 + $0x58] sm:$0xff]  ;;  %v154_v27 = vmul.f32 %v539_v35, %v98_v9 }
  0x9c   :  { %v373_v39 = vmax.f32 %v357_v16, 0.0  ;;  %v374_v40 = vmax.f32 %v358_v17, 0.0  ;;  %v73_v16 = vadd.f32 %v57_v63, %v41_v57  ;;  %v74_v17 = vadd.f32 %v58_v62, %v42_v61  ;;  %v289_v61 = vld [vmem:[%s874_s4 + $0x60] sm:$0xff] }
  0x9d   :  { %v296_v44 = vpop.permute.xlu1 %295  ;;  %v235_v46 = vpop.permute.xlu0 %234  ;;  %v257_v32 = vadd.f32 %v241_v6, %v161_v15  ;;  %v258_v31 = vadd.f32 %v242_v7, %v162_v54 }
  0x9e   :  { %389 = vst [vmem:[%s875_s8 + $0x40] sm:$0xff] %v373_v39  ;;  %v333_v51 = vmul.f32 %v296_v44, %v277_v18  ;;  %v334_v52 = vmul.f32 %v296_v44, %v278_v34  ;;  %v251_v53 = vmul.f32 %v235_v46, %v195_v23  ;;  %v252_v30 = vmul.f32 %v235_v46, %v196_v24  ;;  %v284_v18 = vld [vmem:[%s874_s4 + $0x38] sm:$0xff]  ;;  %v193_v46 = vld [vmem:[%s873_s3 + $0x60] sm:$0xff] }
  0x9f   :  { %390 = vst [vmem:[%s875_s8 + $0x48] sm:$0xff] %v374_v40  ;;  %v259_v23 = vadd.f32 %v243_v4, %v163_v55  ;;  %v260_v24 = vadd.f32 %v244_v5, %v164_v56  ;;  %v191_v40 = vld [vmem:[%s873_s3 + $0x50] sm:$0xff]  ;;  %v248_v55 = vmul.f32 %v663_v49, %v192_v41  ;;  %v167_v56 = vadd.f32 %v709_v14, %v642_v36  ;;  %v288_v14 = vld [vmem:[%s874_s4 + $0x58] sm:$0xff] }
  0xa0   :  { %v349_v0 = vadd.f32 %v333_v51, %v253_v45  ;;  %v350_v1 = vadd.f32 %v334_v52, %v254_v29  ;;  %v267_v2 = vadd.f32 %v251_v53, %v171_v42  ;;  %v268_v3 = vadd.f32 %v252_v30, %v172_v43  ;;  %v287_v36 = vld [vmem:[%s874_s4 + $0x50] sm:$0xff] }
  0xa1   :  { %v72_v45 = vadd.f32 %v56_v59, %v40_v37  ;;  %v152_v29 = vmul.f32 %v523_v26, %v96_v21  ;;  %v169_v53 = vadd.f32 %v153_v25, %v73_v16  ;;  %v170_v30 = vadd.f32 %v154_v27, %v74_v17 }
  0xa2   :  { %v365_v10 = vmax.f32 %v349_v0, 0.0  ;;  %v366_v11 = vmax.f32 %v350_v1, 0.0  ;;  %v363_v12 = vadd.f32 %v347_v58, %v267_v2  ;;  %v364_v13 = vadd.f32 %v348_v60, %v268_v3 }
  0xa3   :  { %v247_v26 = vmul.f32 %v663_v49, %v191_v40  ;;  %v168_v63 = vadd.f32 %v152_v29, %v72_v45  ;;  %v249_v62 = vmul.f32 %v535_v33, %v193_v46  ;;  %v250_v0 = vmul.f32 %v535_v33, %v194_v47  ;;  %v290_v49 = vld [vmem:[%s874_s4 + $0x68] sm:$0xff] }
  0xa4   :  { %381 = vst [vmem:[%s875_s8] sm:$0xff] %v365_v10  ;;  %v379_v22 = vmax.f32 %v363_v12, 0.0  ;;  %v380_v34 = vmax.f32 %v364_v13, 0.0 }
  0xa5   :  { %382 = vst [vmem:[%s875_s8 + $0x8] sm:$0xff] %v366_v11  ;;  %v311_v38 = vpop.permute.xlu1 %310  ;;  %v306_v39 = vpop.permute.xlu0 %305  ;;  %v263_v2 = vadd.f32 %v247_v26, %v167_v56  ;;  %v264_v3 = vadd.f32 %v248_v55, %v168_v63  ;;  %v265_v4 = vadd.f32 %v249_v62, %v169_v53  ;;  %v266_v5 = vadd.f32 %v250_v0, %v170_v30 }
  0xa6   :  { %395 = vst [vmem:[%s875_s8 + $0x70] sm:$0xff] %v379_v22  ;;  %v339_v35 = vmul.f32 %v311_v38, %v283_v28  ;;  %v340_v42 = vmul.f32 %v311_v38, %v284_v18  ;;  %v337_v43 = vmul.f32 %v306_v39, %v281_v19  ;;  %v338_v44 = vmul.f32 %v306_v39, %v282_v20 }
  0xa7   :  { %396 = vst [vmem:[%s875_s8 + $0x78] sm:$0xff] %v380_v34 }
  0xa8   :  { %v355_v48 = vadd.f32 %v339_v35, %v259_v23  ;;  %v356_v50 = vadd.f32 %v340_v42, %v260_v24  ;;  %v353_v51 = vadd.f32 %v337_v43, %v257_v32  ;;  %v354_v52 = vadd.f32 %v338_v44, %v258_v31 }
  0xaa   :  { %v371_v57 = vmax.f32 %v355_v48, 0.0  ;;  %v372_v58 = vmax.f32 %v356_v50, 0.0  ;;  %v369_v60 = vmax.f32 %v353_v51, 0.0  ;;  %v370_v1 = vmax.f32 %v354_v52, 0.0 }
  0xac   :  { %387 = vst [vmem:[%s875_s8 + $0x30] sm:$0xff] %v371_v57 }
  0xad   :  { %388 = vst [vmem:[%s875_s8 + $0x38] sm:$0xff] %v372_v58  ;;  %v326_v33 = vpop.permute.xlu1 %325  ;;  %v321_v6 = vpop.permute.xlu0 %320 }
  0xae   :  { %385 = vst [vmem:[%s875_s8 + $0x20] sm:$0xff] %v369_v60  ;;  %v345_v7 = vmul.f32 %v326_v33, %v289_v61  ;;  %v346_v8 = vmul.f32 %v326_v33, %v290_v49  ;;  %v343_v9 = vmul.f32 %v321_v6, %v287_v36  ;;  %v344_v10 = vmul.f32 %v321_v6, %v288_v14 }
  0xaf   :  { %386 = vst [vmem:[%s875_s8 + $0x28] sm:$0xff] %v370_v1 }
  0xb0   :  { %v361_v11 = vadd.f32 %v345_v7, %v265_v4  ;;  %v362_v12 = vadd.f32 %v346_v8, %v266_v5  ;;  %v359_v13 = vadd.f32 %v343_v9, %v263_v2  ;;  %v360_v28 = vadd.f32 %v344_v10, %v264_v3 }
  0xb2   :  { %v377_v15 = vmax.f32 %v361_v11, 0.0  ;;  %v378_v54 = vmax.f32 %v362_v12, 0.0  ;;  %v375_v16 = vmax.f32 %v359_v13, 0.0  ;;  %v376_v17 = vmax.f32 %v360_v28, 0.0 }
  0xb4   :  { %393 = vst [vmem:[%s875_s8 + $0x60] sm:$0xff] %v377_v15 }
  0xb5   :  { %394 = vst [vmem:[%s875_s8 + $0x68] sm:$0xff] %v378_v54 }
  0xb6   :  { %391 = vst [vmem:[%s875_s8 + $0x50] sm:$0xff] %v375_v16 }
  0xb7   :  { %392 = vst [vmem:[%s875_s8 + $0x58] sm:$0xff] %v376_v17 }

</bundles_post_ra>
